<compile_context>
chip_gen: v7x
topology: tpu7x:2x2x1
jax: 0.10.0
libtpu: 0.0.40
codegen_flags: <defaults>
</compile_context>

<pallas_src>
import functools
import math

import jax
import jax.numpy as jnp
from jax import lax
from jax.experimental import pallas as pl
from jax.experimental.pallas import tpu as pltpu

_NEG_BIG = -1e30  # additive "masked" value; exp() underflows to exactly 0 in f32


# --------------------------------------------------------------------------
# helpers
# --------------------------------------------------------------------------
def _round_up(x, m):
    return ((x + m - 1) // m) * m


def _vmem_capacity_bytes():
    """Physical VMEM of the current chip; conservative 64 MiB fallback."""
    try:
        info = pltpu.get_tpu_info()
        cap = getattr(info, "vmem_capacity_bytes", None)
        if cap:
            return int(cap)
    except Exception:
        pass
    return 64 << 20  # v7x-sized fallback (safe on every generation)


def _vmem_estimate(tq, s, d, qkv_isz, score_isz, mask_isz):
    """Per-step VMEM: double-buffered pipeline blocks + f32 softmax temps."""
    blocks = (
        tq * d * qkv_isz        # q block
        + 2 * s * d * qkv_isz   # k, v (full per head)
        + tq * d * qkv_isz      # output block
        + tq * s * score_isz    # score block
        + tq * s * mask_isz     # mask block (0 if absent)
    )
    interm = 3 * tq * s * 4      # ~3 live f32 (TQ, S) copies: attn, p, score
    return 2 * blocks + interm + (2 << 20)


def _choose_tq(s, d, qkv_isz, score_isz, mask_isz, budget):
    """Largest query tile (multiple of 8, preferring multiples of 128) that
    fits the VMEM budget.  Never falls back to TQ = S for large S."""
    s8 = _round_up(s, 8)
    cands = []
    if s8 <= 512:
        cands.append(s8)  # whole query axis in one block (small S)
    cands += [c for c in (512, 384, 256, 128, 64, 32, 16, 8) if c < s8]
    for tq in cands:
        if _vmem_estimate(tq, s, d, qkv_isz, score_isz, mask_isz) <= budget:
            return tq
    return 8


# --------------------------------------------------------------------------
# kernel bodies
# --------------------------------------------------------------------------
def _qk_logits(q, k, scale, compute_dtype):
    if compute_dtype is not None:
        q = q.astype(compute_dtype)
        k = k.astype(compute_dtype)
    # Contract the last dims of both operands -> no explicit k.T (no XLU vxpose).
    attn = lax.dot_general(
        q, k, dimension_numbers=(((1,), (1,)), ((), ())),
        preferred_element_type=jnp.float32)
    return attn * scale


def _apply_causal(attn, row0):
    tq, s = attn.shape
    rows = lax.broadcasted_iota(jnp.int32, (tq, s), 0) + row0
    cols = lax.broadcasted_iota(jnp.int32, (tq, s), 1)
    return jnp.where(cols <= rows, attn, _NEG_BIG)


def _softmax_matmul(attn_f32, v, o_ref, s_ref, compute_dtype):
    attn = attn_f32 - jnp.max(attn_f32, axis=-1, keepdims=True)
    p = jnp.exp(attn)
    # Exact normalization (NOT pl.reciprocal(approx=True)): the approximate
    # reciprocal's error exceeded the comparison tolerance on masked rows and
    # the denominator is only (TQ, 1) elements, so exact costs nothing.
    score = p * (1.0 / jnp.sum(p, axis=-1, keepdims=True))
    pv_dtype = compute_dtype if compute_dtype is not None else v.dtype
    out = jnp.dot(score.astype(pv_dtype), v.astype(pv_dtype),
                  preferred_element_type=jnp.float32)
    o_ref[0] = out.astype(o_ref.dtype)
    s_ref[0] = score.astype(s_ref.dtype)


def _sdpa_kernel_nomask(q_ref, k_ref, v_ref, o_ref, s_ref, *,
                        scale, causal, tq, compute_dtype):
    attn = _qk_logits(q_ref[0], k_ref[0], scale, compute_dtype)
    if causal:
        attn = _apply_causal(attn, pl.program_id(1) * tq)
    _softmax_matmul(attn, v_ref[0], o_ref, s_ref, compute_dtype)


def _sdpa_kernel_mask(q_ref, k_ref, v_ref, m_ref, o_ref, s_ref, *,
                      scale, causal, tq, compute_dtype, mask_is_bool):
    attn = _qk_logits(q_ref[0], k_ref[0], scale, compute_dtype)
    m = m_ref[0]  # (TQ, S), narrow dtype; widened / converted in-kernel
    if mask_is_bool:
        attn = jnp.where(m != 0, attn, _NEG_BIG)        # True = attend
    else:
        attn = attn + m.astype(jnp.float32)             # additive mask
    if causal:
        attn = _apply_causal(attn, pl.program_id(1) * tq)
    _softmax_matmul(attn, v_ref[0], o_ref, s_ref, compute_dtype)


# --------------------------------------------------------------------------
# wrapper
# --------------------------------------------------------------------------
def scale_dot_product_attention(q, k, v, mask=None, *, is_causal=False,
                                use_bf16_matmul=False, score_dtype=None):
    """Pallas equivalent of ScaleDotProductAttention.forward.

    q, k, v: (batch, n_head, seq_len, d_k)
    mask:    additive mask broadcastable to (batch, n_head, S, S); boolean
             masks are interpreted as True = attend / False = masked.
    is_causal: generate a causal mask in-kernel (no mask DMA).
    returns: (output, score) with output (b, h, S, d_k) and score (b, h, S, S).
    """
    b, h, s, d_k = q.shape
    bh = b * h
    scale = 1.0 / math.sqrt(float(d_k))
    score_dtype = jnp.dtype(score_dtype) if score_dtype is not None else q.dtype
    compute_dtype = (jnp.bfloat16
                     if (use_bf16_matmul and q.dtype == jnp.float32) else None)

    qf = q.reshape(bh, s, d_k)
    kf = k.reshape(bh, s, d_k)
    vf = v.reshape(bh, s, d_k)

    qkv_isz = jnp.dtype(q.dtype).itemsize
    score_isz = jnp.dtype(score_dtype).itemsize

    # ---- mask preprocessing: keep narrow dtype, broadcast via index_map ----
    maskf = None
    mask_isz = 0
    mask_is_bool = False
    m_index = None
    if mask is not None:
        m = jnp.asarray(mask)
        while m.ndim < 4:
            m = m[None]
        if m.dtype == jnp.bool_:
            mask_is_bool = True
            m = m.astype(jnp.int8)                      # 1 byte/elem in HBM
        elif not jnp.issubdtype(m.dtype, jnp.floating):
            m = m.astype(jnp.float32)
        mb, mh = m.shape[0], m.shape[1]
        if mb not in (1, b) or mh not in (1, h):
            raise ValueError(f"mask dims {m.shape} not broadcastable to "
                             f"{(b, h, s, s)}")
        # Broadcast only the trailing (S, S) dims; batch/head broadcasting is
        # done by the index_map (no dense bh-fold copy in HBM).
        m = jnp.broadcast_to(m, (mb, mh, s, s))
        maskf = m.reshape(mb * mh, s, s)
        mask_isz = jnp.dtype(maskf.dtype).itemsize
        if mb == 1 and mh == 1:
            m_index = lambda i, j: (0, j, 0)
        elif mb == 1:
            m_index = lambda i, j: (i % h, j, 0)
        elif mh == 1:
            m_index = lambda i, j: (i // h, j, 0)
        else:
            m_index = lambda i, j: (i, j, 0)

    # ---- per-generation VMEM budget and query tile ------------------------
    budget = int(0.75 * _vmem_capacity_bytes())   # ~48 MiB v7x, ~96 MiB v5e/v6e
    tq = _choose_tq(s, d_k, qkv_isz, score_isz, mask_isz, budget)

    # Pad the query axis only (padded rows are discarded afterwards); the key
    # axis is untouched so the softmax denominator needs no extra masking.
    s_pad = _round_up(s, tq)
    pad_q = s_pad - s
    if pad_q:
        qf = jnp.pad(qf, ((0, 0), (0, pad_q), (0, 0)))
        if maskf is not None:
            maskf = jnp.pad(maskf, ((0, 0), (0, pad_q), (0, 0)))
    n_tq = s_pad // tq

    # ---- block specs -------------------------------------------------------
    q_spec = pl.BlockSpec((1, tq, d_k), lambda i, j: (i, j, 0))
    kv_spec = pl.BlockSpec((1, s, d_k), lambda i, j: (i, 0, 0))  # full K/V per head
    o_spec = pl.BlockSpec((1, tq, d_k), lambda i, j: (i, j, 0))
    sc_spec = pl.BlockSpec((1, tq, s), lambda i, j: (i, j, 0))

    if maskf is None:
        kernel = functools.partial(_sdpa_kernel_nomask, scale=scale,
                                   causal=is_causal, tq=tq,
                                   compute_dtype=compute_dtype)
        in_specs = [q_spec, kv_spec, kv_spec]
        args = (qf, kf, vf)
    else:
        kernel = functools.partial(_sdpa_kernel_mask, scale=scale,
                                   causal=is_causal, tq=tq,
                                   compute_dtype=compute_dtype,
                                   mask_is_bool=mask_is_bool)
        in_specs = [q_spec, kv_spec, kv_spec, pl.BlockSpec((1, tq, s), m_index)]
        args = (qf, kf, vf, maskf)

    out_f, score_f = pl.pallas_call(
        kernel,
        out_shape=(
            jax.ShapeDtypeStruct((bh, s_pad, d_k), q.dtype),
            jax.ShapeDtypeStruct((bh, s_pad, s), score_dtype),
        ),
        grid_spec=pltpu.PrefetchScalarGridSpec(
            num_scalar_prefetch=0,
            grid=(bh, n_tq),                    # bh leading -> megacore balance
            in_specs=in_specs,
            out_specs=[o_spec, sc_spec],
        ),
        compiler_params=pltpu.CompilerParams(
            dimension_semantics=("parallel", "parallel"),
            vmem_limit_bytes=budget,
        ),
    )(*args)

    if pad_q:
        out_f = out_f[:, :s, :]
        score_f = score_f[:, :s, :]
    return out_f.reshape(b, h, s, d_k), score_f.reshape(b, h, s, s)


# --------------------------------------------------------------------------
# reference + smoke test
# --------------------------------------------------------------------------
def _reference(q, k, v, mask=None):
    d_k = k.shape[-1]
    attn = jnp.einsum("bhqd,bhkd->bhqk", q, k) / (d_k ** 0.5)
    if mask is not None:
        attn = attn + mask
    score = jax.nn.softmax(attn, axis=-1)
    out = jnp.einsum("bhqk,bhkd->bhqd", score, v)
    return out, score


if __name__ == "__main__":
    key = jax.random.PRNGKey(0)
    kq, kk, kv = jax.random.split(key, 3)

    batch, n_head, seq_len, d_k = 2, 4, 8, 32
    q = jax.random.normal(kq, (batch, n_head, seq_len, d_k), dtype=jnp.float32)
    k = jax.random.normal(kk, (batch, n_head, seq_len, d_k), dtype=jnp.float32)
    v = jax.random.normal(kv, (batch, n_head, seq_len, d_k), dtype=jnp.float32)

    # --- 1) maskless path ---------------------------------------------------
    out, score = scale_dot_product_attention(q, k, v, mask=None)
    jax.block_until_ready((out, score))
    ref_out, ref_score = _reference(q, k, v, mask=None)
    assert jnp.allclose(out, ref_out, atol=2e-3, rtol=2e-3)
    assert jnp.allclose(score, ref_score, atol=2e-3, rtol=2e-3)

    # --- 2) shared additive (causal) float mask, as in the PyTorch module ---
    causal_add = jnp.where(
        jnp.tril(jnp.ones((seq_len, seq_len), dtype=jnp.bool_)),
        0.0, -1e9).astype(jnp.float32)[None, None]          # (1, 1, S, S)
    out_m, score_m = scale_dot_product_attention(q, k, v, mask=causal_add)
    jax.block_until_ready((out_m, score_m))
    ref_out_m, ref_score_m = _reference(q, k, v, mask=causal_add)
    assert jnp.allclose(out_m, ref_out_m, atol=2e-3, rtol=2e-3)
    assert jnp.allclose(score_m, ref_score_m, atol=2e-3, rtol=2e-3)

    # --- 3) in-kernel causal fast path (no mask DMA at all) ------------------
    out_c, score_c = scale_dot_product_attention(q, k, v, mask=None,
                                                 is_causal=True)
    jax.block_until_ready((out_c, score_c))
    assert jnp.allclose(out_c, ref_out_m, atol=2e-3, rtol=2e-3)
    assert jnp.allclose(score_c, ref_score_m, atol=2e-3, rtol=2e-3)

    print("KERNEL_OK")
</pallas_src>

<mosaic_0001>
module attributes {stable_mosaic.version = 11 : i64} {
  func.func @_sdpa_kernel_nomask(%arg0: i32, %arg1: i32, %arg2: memref<1x8x32xf32, #tpu.memory_space<vmem>>, %arg3: memref<1x8x32xf32, #tpu.memory_space<vmem>>, %arg4: memref<1x8x32xf32, #tpu.memory_space<vmem>>, %arg5: memref<1x8x32xf32, #tpu.memory_space<vmem>>, %arg6: memref<1x8x8xf32, #tpu.memory_space<vmem>>) attributes {dimension_semantics = [#tpu.dimension_semantics<parallel>, #tpu.dimension_semantics<parallel>], iteration_bounds = array<i64: 8, 1>, scalar_prefetch = 0 : i64, scratch_operands = 0 : i64, tpu.core_type = #tpu.core_type<tc>, window_params = [{transform_indices = @transform_0, window_bounds = array<i64: 1, 8, 32>}, {transform_indices = @transform_1, window_bounds = array<i64: 1, 8, 32>}, {transform_indices = @transform_2, window_bounds = array<i64: 1, 8, 32>}, {transform_indices = @transform_3, window_bounds = array<i64: 1, 8, 32>}, {transform_indices = @transform_4, window_bounds = array<i64: 1, 8, 8>}]} {
    %c0 = arith.constant 0 : index
    %c0_0 = arith.constant 0 : index
    %c0_1 = arith.constant 0 : index
    %0 = vector.load %arg2[%c0, %c0_0, %c0_1] : memref<1x8x32xf32, #tpu.memory_space<vmem>>, vector<1x8x32xf32>
    %1 = vector.shape_cast %0 : vector<1x8x32xf32> to vector<8x32xf32>
    %c0_2 = arith.constant 0 : index
    %c0_3 = arith.constant 0 : index
    %c0_4 = arith.constant 0 : index
    %2 = vector.load %arg3[%c0_2, %c0_3, %c0_4] : memref<1x8x32xf32, #tpu.memory_space<vmem>>, vector<1x8x32xf32>
    %3 = vector.shape_cast %2 : vector<1x8x32xf32> to vector<8x32xf32>
    %cst = arith.constant dense<0.000000e+00> : vector<8x8xf32>
    %4 = tpu.matmul %1, %3, %cst {dimension_numbers = #tpu.dot_dimension_numbers<[1], [1], [0], [0], [0, 0, 1, 0], [], []>} : vector<8x32xf32>, vector<8x32xf32>, vector<8x8xf32> -> vector<8x8xf32>
    %cst_5 = arith.constant 0.176776692 : f32
    %5 = vector.broadcast %cst_5 : f32 to vector<8x8xf32>
    %6 = arith.mulf %4, %5 : vector<8x8xf32>
    %c0_6 = arith.constant 0 : index
    %c0_7 = arith.constant 0 : index
    %c0_8 = arith.constant 0 : index
    %7 = vector.load %arg4[%c0_6, %c0_7, %c0_8] : memref<1x8x32xf32, #tpu.memory_space<vmem>>, vector<1x8x32xf32>
    %8 = vector.shape_cast %7 : vector<1x8x32xf32> to vector<8x32xf32>
    %cst_9 = arith.constant dense<0xFF800000> : vector<8xf32>
    %9 = vector.multi_reduction <maximumf>, %6, %cst_9 [1] : vector<8x8xf32> to vector<8xf32>
    %10 = vector.shape_cast %9 : vector<8xf32> to vector<8x1xf32>
    %11 = vector.broadcast %10 : vector<8x1xf32> to vector<8x8xf32>
    %12 = arith.subf %6, %11 : vector<8x8xf32>
    %13 = math.exp %12 : vector<8x8xf32>
    %cst_10 = arith.constant dense<0.000000e+00> : vector<8xf32>
    %14 = vector.multi_reduction <add>, %13, %cst_10 [1] : vector<8x8xf32> to vector<8xf32>
    %15 = vector.shape_cast %14 : vector<8xf32> to vector<8x1xf32>
    %cst_11 = arith.constant 1.000000e+00 : f32
    %16 = vector.broadcast %cst_11 : f32 to vector<8x1xf32>
    %17 = arith.divf %16, %15 : vector<8x1xf32>
    %18 = vector.broadcast %17 : vector<8x1xf32> to vector<8x8xf32>
    %19 = arith.mulf %13, %18 : vector<8x8xf32>
    %cst_12 = arith.constant dense<0.000000e+00> : vector<8x32xf32>
    %20 = tpu.matmul %19, %8, %cst_12 {dimension_numbers = #tpu.dot_dimension_numbers<[1], [0], [0], [1], [0, 0, 1, 1], [], []>} : vector<8x8xf32>, vector<8x32xf32>, vector<8x32xf32> -> vector<8x32xf32>
    %c0_13 = arith.constant 0 : index
    %c0_14 = arith.constant 0 : index
    %c0_15 = arith.constant 0 : index
    %21 = vector.load %arg5[%c0_13, %c0_14, %c0_15] : memref<1x8x32xf32, #tpu.memory_space<vmem>>, vector<1x8x32xf32>
    %22 = vector.shape_cast %21 : vector<1x8x32xf32> to vector<8x32xf32>
    %23 = vector.shape_cast %20 : vector<8x32xf32> to vector<1x8x32xf32>
    tpu.vector_store %arg5[%c0_13, %c0_14, %c0_15], %23 {strides = array<i32>} : memref<1x8x32xf32, #tpu.memory_space<vmem>>, vector<1x8x32xf32>,
    %c0_16 = arith.constant 0 : index
    %c0_17 = arith.constant 0 : index
    %c0_18 = arith.constant 0 : index
    %24 = vector.load %arg6[%c0_16, %c0_17, %c0_18] : memref<1x8x8xf32, #tpu.memory_space<vmem>>, vector<1x8x8xf32>
    %25 = vector.shape_cast %24 : vector<1x8x8xf32> to vector<8x8xf32>
    %26 = vector.shape_cast %19 : vector<8x8xf32> to vector<1x8x8xf32>
    tpu.vector_store %arg6[%c0_16, %c0_17, %c0_18], %26 {strides = array<i32>} : memref<1x8x8xf32, #tpu.memory_space<vmem>>, vector<1x8x8xf32>,
    return
  }
  func.func @transform_0(%arg0: i32, %arg1: i32) -> (i32, i32, i32) {
    %c0_i32 = arith.constant 0 : i32
    %c0_i32_0 = arith.constant 0 : i32
    return %arg0, %arg1, %c0_i32 : i32, i32, i32
  }
  func.func @transform_1(%arg0: i32, %arg1: i32) -> (i32, i32, i32) {
    %c0_i32 = arith.constant 0 : i32
    %c0_i32_0 = arith.constant 0 : i32
    %c0_i32_1 = arith.constant 0 : i32
    return %arg0, %c0_i32, %c0_i32_0 : i32, i32, i32
  }
  func.func @transform_2(%arg0: i32, %arg1: i32) -> (i32, i32, i32) {
    %c0_i32 = arith.constant 0 : i32
    %c0_i32_0 = arith.constant 0 : i32
    %c0_i32_1 = arith.constant 0 : i32
    return %arg0, %c0_i32, %c0_i32_0 : i32, i32, i32
  }
  func.func @transform_3(%arg0: i32, %arg1: i32) -> (i32, i32, i32) {
    %c0_i32 = arith.constant 0 : i32
    %c0_i32_0 = arith.constant 0 : i32
    return %arg0, %arg1, %c0_i32 : i32, i32, i32
  }
  func.func @transform_4(%arg0: i32, %arg1: i32) -> (i32, i32, i32) {
    %c0_i32 = arith.constant 0 : i32
    %c0_i32_0 = arith.constant 0 : i32
    return %arg0, %arg1, %c0_i32 : i32, i32, i32
  }
}

</mosaic_0001>

<bundles_post_ra>
// kernel: tpu_custom_call.1
= control target key start
LH: loop header
LB: loop body
LE: loop exit
PB: predicated region body
PF: predicated region fallthrough
CT: control target
= control target key end

     0   :  { %s1334_s0 = inlined_call_operand.hbm [shape: f32[8,8,32], index: 0, kind: input, shape index: {}]   ;;  %s1335_s1 = inlined_call_operand.hbm [shape: f32[8,8,32], index: 1, kind: input, shape index: {}]   ;;  %s1336_s2 = inlined_call_operand.hbm [shape: f32[8,8,32], index: 2, kind: input, shape index: {}]   ;;  %s1337_s3 = inlined_call_operand.hbm [shape: f32[8,8,32], index: 3, kind: output, shape index: {0}]   ;;  %s1338_s4 = inlined_call_operand.hbm [shape: f32[8,8,8], index: 4, kind: output, shape index: {1}]  }
   0x1   :  { %1346 = sst [smem:[#allocation19_spill]] %s1335_s1 }
   0x2   :  { %10 = vsyncpa [#allocation3], 0 }
   0x3   :  { %12 = vsyncpa [#allocation3 + $0x1], 0 }
   0x4   :  { %13 = vsyncpa [#allocation6], 0 }
   0x5   :  { %15 = vsyncpa [#allocation6 + $0x1], 0 }
   0x6   :  { %16 = vsyncpa [#allocation4], 0 }
   0x7   :  { %18 = vsyncpa [#allocation4 + $0x1], 0 }
   0x8   :  { %19 = vsyncpa [#allocation10], 0 }
   0x9   :  { %21 = vsyncpa [#allocation10 + $0x1], 0  ;;  %s1037_s15 = smov 0   ;;  %s1039_s16 = smov 0  }
   0xa   :  { %s1041_s17 = smov 0   ;;  %s1043_s18 = smov 0  }
   0xb   :  { %s1045_s19 = smov 0   ;;  %s1047_s20 = smov 0  }
   0xc LB: > { %1347 = sst [smem:[#allocation15_spill]] %s999_s19  ;;  %s1068_s21 = sadd.s32 4294967295, %s1003_s20   ;;  %s1003_s20 = sphi %s1047_s20, %s27_s20   ;;  %s999_s19 = sphi %s1045_s19, %s1370_s19   ;;  %s995_s18 = sphi %s1043_s18, %s1369_s18   ;;  %s991_s17 = sphi %s1041_s17, %s1373_s17   ;;  %s987_s16 = sphi %s1039_s16, %s1372_s16   ;;  %s983_s15 = sphi %s1037_s15, %s1371_s15  }
   0xd   : > { %s674_s22 = sadd.s32 4294967294, %s1003_s20   ;;  %s39_s23 = sadd.s32 1, %s999_s19 }
   0xe   : > { %s48_s24 = sadd.s32 1, %s991_s17  ;;  %p41_p0 = scmp.ge.s32.totalorder %s39_s23, 8 }
   0xf   : > { %p55_p1 = scmp.ne.s32.totalorder %s991_s17, %s987_s16  ;;  %p56_p2 = scmp.eq.s32.totalorder %s1003_s20, 0 }
  0x10   : > { %p61_p3 = scmp.ne.s32.totalorder %s987_s16, %s983_s15  ;;  %s1375_s23 = smov (%p41_p0, %s39_s23), 0 }
  0x11   : > { %1348 = sst [smem:[#allocation16_spill]] %s1375_s23  ;;  %p1080_p4 = por %p56_p2, %p55_p1 }
  0x12   : > { %p62_p5 = scmp.eq.s32.totalorder %s1068_s21, 0  ;;  %s43_s26 = ssub.s32 %s999_s19, %s1375_s23 }
  0x13   : > { %p139_p6 = scmp.eq.s32.totalorder %s1068_s21, 7  ;;  %p46_p7 = scmp.eq.s32.totalorder %s43_s26, 0 }
  0x14   : > { %p1088_p8 = por %p62_p5, %p61_p3  ;;  %p145_p10 = scmp.eq.s32.totalorder %s674_s22, 7 }
  0x15   : > { %p1092_p9 = por %p139_p6, %p55_p1  ;;  %p739_p12 = scmp.lt.s32.totalorder %s1003_s20, 8 }
  0x16   : > { %s1350_s27 = scalar_select %p1088_p8, 1, 0 }
  0x17   : > { %s1351_s28 = scalar_select %p1092_p9, 1, 0 }
  0x18   : > { %s1097_s29 = scalar_select %p46_p7, %s991_s17, %s48_s24  }
  0x19   : > { %p1099_p11 = por %p145_p10, %p61_p3  ;;  %s1339_s5 = sand.u32 1, %s991_s17  }
  0x1a   : > { %1352 = sst [smem:[#allocation17_spill]] %s1097_s29  ;;  %s1107_s6 = sshll.u32 %s1339_s5, 3 }
  0x1b   : > { %s1353_s30 = scalar_select %p1099_p11, 1, 0 }
  0x1c   : > { %s1110_s7 = sshll.u32 %s999_s19, 7  ;;  %p1114_p13 = pnand %p739_p12, %p1080_p4 }
  0x1d   : > { %1354 = sst [smem:[#allocation18_spill]] %s1353_s30  ;;  %s212_s9 = sand.u32 1, %s1003_s20  }
  0x1e   : > { %s1355_s8 = scalar_select %p1114_p13, 1, 0 }
  0x1f   : > { %s1356_s1 = sld [smem:[#allocation19_spill]]  ;;  %s216_s13 = scalar_lea.vmem [#allocation5], %s1107_s6 }
  0x20   : > { %s223_s14 = sshll.u32 %s216_s13, 4  ;;  %s1130_s22 = scalar_lea.sflag [#allocation6], %s212_s9  ;;  %s1127_s14 = int_to_ptr.vmem [resolvable:$true] %s223_s14 }
  0x21   : > { %p1136_p3 = pneg %p1114_p13 }
  0x25   : > { %s1123_s12 = scalar_lea.hbm %s1356_s1, %s1110_s7  ;;  %s800_s11 = scalar_lea.hbm %s1356_s1, 1024 }
  0x26   : > { %s795_s24 = scalar_lea.hbm %s1123_s12, 128  ;;  %p801_p6 = scmp.lt.u32.totalorder %s1123_s12, %s1356_s1 }
  0x27   : > { %p796_p2 = scmp.ne.s32.totalorder %s1123_s12, %s795_s24  ;;  %p802_p7 = scmp.lt.u32.totalorder %s800_s11, %s795_s24 }
  0x28   : > { %p804_p12 = scmp.lt.u32.totalorder %s795_s24, %s1123_s12 }
  0x29   : > { %p798_p4 = pnand %p1136_p3, %p796_p2  ;;  %p803_p10 = por %p802_p7, %p801_p6 }
  0x2b   : > { %p799_p5 = pneg %p798_p4  ;;  %p805_p0 = por %p804_p12, %p803_p10 }
  0x2d   : > { %p806_p1 = pnand %p805_p0, %p799_p5 }
  0x2f   : > { %809 = shalt.err (!%p806_p1)
}
  0x30   : > { %s810_s9 = scalar_lea.vmem %s1127_s14, 128  ;;  %s1005_s26 = smov [#allocation5]  }
  0x31   : > { %p811_p2 = scmp.ne.s32.totalorder %s1127_s14, %s810_s9  ;;  %s815_s10 = sshll.u32 %s1005_s26, 4  ;;  %s816_s10 = int_to_ptr.vmem [resolvable:$false] %s815_s10 }
  0x32   : > { %s817_s5 = scalar_lea.vmem %s816_s10, 256  ;;  %p818_p9 = scmp.lt.s32.totalorder %s1127_s14, %s816_s10 }
  0x33   : > { %p813_p4 = pnand %p811_p2, %p1136_p3  ;;  %p819_p8 = scmp.lt.s32.totalorder %s817_s5, %s810_s9 }
  0x35   : > { %p814_p11 = pneg %p813_p4  ;;  %p820_p6 = por %p819_p8, %p818_p9 }
  0x37   : > { %p821_p7 = pnand %p820_p6, %p814_p11 }
  0x39   : > { %824 = shalt.err (!%p821_p7)
}
  0x3a   : > { %728 = dma.hbm_to_vmem [thread:$0]  (!%p1114_p13), %s1123_s12, 128, %s1127_s14, %s1130_s22  }
  0x3b   : > { %p1358_p0 = scmp.lt.s32.totalorder %s1003_s20, 9  ;;  %p1359_p1 = scmp.ge.s32.totalorder %s1003_s20, 1 }
  0x3c   : > { %s1172_s9 = scalar_lea.hbm %s1334_s0, %s1110_s7  ;;  %s197_s26 = scalar_lea.vmem [#allocation2], %s1107_s6 }
  0x3d   : > { %p1164_p5 = pnand %p1359_p1, %p1358_p0  ;;  %s205_s10 = sshll.u32 %s197_s26, 4  ;;  %s1175_s10 = int_to_ptr.vmem [resolvable:$true] %s205_s10 }
  0x3e   : > { %s1181_s5 = scalar_lea.hbm %s1336_s2, %s1110_s7  ;;  %s1361_s1 = sand.u32 1, %s991_s17  }
  0x3f   : > { %s1360_s24 = scalar_select %p1164_p5, 1, 0 }
  0x40   : > { %s194_s23 = scalar_lea.sflag [#allocation3], %s1361_s1  ;;  %s825_s19 = scalar_lea.hbm %s1172_s9, 128 }
  0x41   : > { %p826_p8 = scmp.ne.s32.totalorder %s1172_s9, %s825_s19  ;;  %s830_s29 = scalar_lea.hbm %s1334_s0, 1024 }
  0x42   : > { %p831_p10 = scmp.lt.u32.totalorder %s1172_s9, %s1334_s0  ;;  %p832_p12 = scmp.lt.u32.totalorder %s830_s29, %s825_s19 }
  0x43   : > { %p828_p9 = pnand %p826_p8, %p1136_p3  ;;  %p834_p4 = scmp.lt.u32.totalorder %s825_s19, %s1172_s9 }
  0x44   : > { %p833_p2 = por %p832_p12, %p831_p10 }
  0x45   : > { %p829_p11 = pneg %p828_p9 }
  0x46   : > { %p835_p6 = por %p834_p4, %p833_p2 }
  0x48   : > { %p836_p7 = pnand %p835_p6, %p829_p11 }
  0x4a   : > { %839 = shalt.err (!%p836_p7)
}
  0x4b   : > { %s840_s1 = scalar_lea.vmem %s1175_s10, 128  ;;  %s1006_s7 = smov [#allocation2]  }
  0x4c   : > { %p841_p0 = scmp.ne.s32.totalorder %s1175_s10, %s840_s1  ;;  %s845_s12 = sshll.u32 %s1006_s7, 4  ;;  %s846_s12 = int_to_ptr.vmem [resolvable:$false] %s845_s12 }
  0x4d   : > { %s847_s30 = scalar_lea.vmem %s846_s12, 256  ;;  %p848_p9 = scmp.lt.s32.totalorder %s1175_s10, %s846_s12 }
  0x4e   : > { %p843_p1 = pnand %p841_p0, %p1136_p3  ;;  %p849_p5 = scmp.lt.s32.totalorder %s847_s30, %s840_s1 }
  0x50   : > { %p844_p8 = pneg %p843_p1  ;;  %p850_p10 = por %p849_p5, %p848_p9 }
  0x52   : > { %p851_p12 = pnand %p850_p10, %p844_p8 }
  0x54   : > { %854 = shalt.err (!%p851_p12)
}
  0x55   : > { %725 = dma.hbm_to_vmem [thread:$0]  (!%p1114_p13), %s1172_s9, 128, %s1175_s10, %s194_s23  }
  0x56   : > { %s234_s19 = scalar_lea.vmem [#allocation7], %s1107_s6  ;;  %s855_s14 = scalar_lea.hbm %s1181_s5, 128 }
  0x57   : > { %s241_s29 = sshll.u32 %s234_s19, 4  ;;  %p856_p11 = scmp.ne.s32.totalorder %s1181_s5, %s855_s14  ;;  %s242_s29 = int_to_ptr.vmem [resolvable:$true] %s241_s29 }
  0x58   : > { %s860_s26 = scalar_lea.hbm %s1336_s2, 1024  ;;  %p861_p4 = scmp.lt.u32.totalorder %s1181_s5, %s1336_s2 }
  0x59   : > { %p858_p5 = pnand %p856_p11, %p1136_p3  ;;  %p862_p6 = scmp.lt.u32.totalorder %s860_s26, %s855_s14 }
  0x5a   : > { %p864_p0 = scmp.lt.u32.totalorder %s855_s14, %s1181_s5 }
  0x5b   : > { %p859_p2 = pneg %p858_p5  ;;  %p863_p7 = por %p862_p6, %p861_p4 }
  0x5d   : > { %p865_p1 = por %p864_p0, %p863_p7 }
  0x5f   : > { %p866_p8 = pnand %p865_p1, %p859_p2 }
  0x61   : > { %869 = shalt.err (!%p866_p8)
}
  0x62   : > { %s870_s23 = scalar_lea.vmem %s242_s29, 128  ;;  %s1007_s6 = smov [#allocation7]  }
  0x63   : > { %p871_p9 = scmp.ne.s32.totalorder %s242_s29, %s870_s23  ;;  %s875_s9 = sshll.u32 %s1007_s6, 4  ;;  %s876_s9 = int_to_ptr.vmem [resolvable:$false] %s875_s9 }
  0x64   : > { %s877_s10 = scalar_lea.vmem %s876_s9, 256  ;;  %p878_p11 = scmp.lt.s32.totalorder %s242_s29, %s876_s9 }
  0x65   : > { %p873_p10 = pnand %p871_p9, %p1136_p3  ;;  %p879_p5 = scmp.lt.s32.totalorder %s877_s10, %s870_s23 }
  0x67   : > { %p874_p12 = pneg %p873_p10  ;;  %p880_p13 = por %p879_p5, %p878_p11 }
  0x69   : > { %p881_p4 = pnand %p880_p13, %p874_p12 }
  0x6b   : > { %884 = shalt.err (!%p881_p4)
}
  0x6c   : > { %p1362_p6 = scmp.ne.s32.totalorder %s1355_s8, 0  ;;  %p1363_p2 = scmp.ne.s32.totalorder %s1360_s24, 0 }
  0x6d   : > { %s1228_s25 = sand.u32 (!%p1363_p2), 1, %s987_s16   ;;  %p1364_p13 = scmp.ne.s32.totalorder (!%p1363_p2), %s1350_s27, 0 }
  0x6e   : > { %731 = dma.hbm_to_vmem [thread:$0]  (!%p1362_p6), %s1181_s5, 128, %s242_s29, %s1130_s22  }
  0x6f   : > { %250 = sbr.rel (%p1363_p2) target bundleno = 882 (0x372), region = 32  ;;  %s1231_s12 = sshll.u32 (!%p1363_p2), %s1228_s25, 3 }
  0x70   : > { %s253_s30 = scalar_lea.sflag (!%p1363_p2), [#allocation3], %s1228_s25  ;;  %s256_s19 = scalar_lea.vmem (!%p1363_p2), [#allocation2], %s1231_s12 }
  0x76   : > { %966 = dma.done.wait (%p1364_p13), %s253_s30, 128  }
  0x77   : > { %968 = vsyncadd (%p1364_p13), %s253_s30, 4294967168  ;;  %s261_s8 = sand.u32 1, %s1068_s21   ;;  %s265_s24 = scalar_lea.vmem [#allocation5], %s1231_s12 }
  0x78   : > { %s262_s22 = scalar_lea.sflag [#allocation6], %s261_s8 }
  0x79   : > { %970 = dma.done.wait (%p1364_p13), %s262_s22, 256  }
  0x7a   : > { %972 = vsyncadd (%p1364_p13), %s262_s22, 4294967040  ;;  %v1008_v0 = vmov 0.0   ;;  %vm1009_vm0 = vmmov 0   ;;  %vm316_vm1 = vcmask 261120   ;;  %v315_v1 = vld [vmem:[%s265_s24] sm:$0xff]  ;;  %v314_v2 = vld [vmem:[%s256_s19] sm:$0xff] }
  0x7b   : > { %702 = vmatprep.subr.mxu0 %v1008_v0  ;;  %704 = vmatprep.mubr.msk.f32.mxu0 %vm1009_vm0, %v1008_v0  ;;  %vm395_vm2 = vcmask 64512   ;;  %s274_s21 = scalar_lea.vmem [#allocation7], %s1231_s12  ;;  %s313_s27 = scalar_lea.vmem [#allocation9], %s1231_s12 }
  0x7c   : > { %707 = vmatprep.subr.mxu1 %v1008_v0  ;;  %709 = vmatprep.mubr.msk.f32.mxu1 %vm1009_vm0, %v1008_v0  ;;  %v394_v12 = vld [vmem:[%s274_s21] sm:$0xff]  ;;  %s694_s5 = sshll.u32 %s995_s18, 7  ;;  %s517_s13 = sshll.u32 %s313_s27, 4  ;;  %s518_s13 = int_to_ptr.vmem [resolvable:$true] %s517_s13 }
  0x7d   : > { %703 = vmatpush3.xpose.msk.msra.mxu0 %vm316_vm1, %v315_v1  ;;  %708 = vmatpush3.msra.mxu1 %v394_v12  ;;  %s1259_s11 = scalar_lea.hbm %s1338_s4, %s694_s5  ;;  %s489_s26 = scalar_lea.sflag [#allocation10], %s1228_s25 }
  0x7e   : > { %s885_s1 = scalar_lea.vmem %s518_s13, 128  ;;  %p1365_p7 = scmp.ne.s32.totalorder %s1351_s28, 0 }
  0x7f   : > { %p886_p3 = scmp.ne.s32.totalorder %s518_s13, %s885_s1  ;;  %s1010_s7 = smov [#allocation9]  }
  0x80   : > { %705 = vmatmul.mubr.msk.f32.vlgmr.msra.gmra.mrb[0].mxu0 %vm316_vm1, %v314_v2  ;;  %s889_s23 = sshll.u32 %s1010_s7, 4  ;;  %s890_s23 = int_to_ptr.vmem [resolvable:$false] %s889_s23 }
  0x81   : > { %p887_p0 = pnand %p886_p3, %p1365_p7  ;;  %s891_s6 = scalar_lea.vmem %s890_s23, 256 }
  0x82   : > { %p892_p8 = scmp.lt.s32.totalorder %s518_s13, %s890_s23  ;;  %p893_p9 = scmp.lt.s32.totalorder %s891_s6, %s885_s1 }
  0x83   : > { %p888_p1 = pneg %p887_p0 }
  0x84   : > { %p894_p10 = por %p893_p9, %p892_p8 }
  0x86   : > { %p895_p12 = pnand %p894_p10, %p888_p1 }
 0x153   : > { %v389_v3 = vpop.f32.mrb[0].mxu0 }
 0x154   : > { %v393_v4 = vmul.f32 0.17677669, %v389_v3  ;;  %v706_v5 = vpop.f32.mrb[1].mxu0 }
 0x156   : > { %v396_v6 = vsel %vm395_vm2, %v393_v4, -inf }
 0x157   : > { %397 = vmax.xlane.f32.xlu0 %v396_v6 }
 0x1e4   : > { %v398_v7 = vpop.xlane.xlu0 %397 }
 0x1e5   : > { %v399_v8 = vsub.f32 %v393_v4, %v398_v7 }
 0x1e7   : > { %v400_v9 = vmul.f32 1.442695, %v399_v8 }
 0x1e9   : > { %791 = vpow2.f32 %v400_v9 }
 0x1f3   : > { %v792_v10 = vpop.eup %791 }
 0x1f4   : > { %v402_v11 = vsel %vm395_vm2, %v792_v10, 0.0 }
 0x1f5   : > { %403 = vadd.xlane.f32.xlu0 %v402_v11 }
 0x282   : > { %v404_v13 = vpop.xlane.xlu0 %403 }
 0x283   : > { %793 = vrcp.f32 %v404_v13 }
 0x28d   : > { %v794_v14 = vpop.eup %793 }
 0x28e   : > { %v407_v15 = vmul.f32 %v794_v14, %v792_v10 }
 0x290   : > { %710 = vmatmul.mubr.msk.f32.vlgmr.msra.gmra.mrb[0].mxu1 %vm395_vm2, %v407_v15  ;;  %482 = vst.msk [vmem:[%s313_s27] sm:$0xff] %vm395_vm2, %v407_v15 }
 0x291   : > { %898 = shalt.err (!%p895_p12)
}
 0x292   : > { %s899_s9 = scalar_lea.hbm %s1259_s11, 128  ;;  %s903_s19 = scalar_lea.hbm %s1338_s4, 1024 }
 0x293   : > { %p900_p11 = scmp.ne.s32.totalorder %s1259_s11, %s899_s9  ;;  %p904_p6 = scmp.lt.u32.totalorder %s1259_s11, %s1338_s4 }
 0x294   : > { %p905_p2 = scmp.lt.u32.totalorder %s903_s19, %s899_s9  ;;  %p907_p3 = scmp.lt.u32.totalorder %s899_s9, %s1259_s11 }
 0x295   : > { %p901_p5 = pnand %p900_p11, %p1365_p7 }
 0x296   : > { %p906_p13 = por %p905_p2, %p904_p6 }
 0x297   : > { %p902_p4 = pneg %p901_p5 }
 0x298   : > { %p908_p0 = por %p907_p3, %p906_p13 }
 0x29a   : > { %p909_p1 = pnand %p908_p0, %p902_p4 }
 0x29c   : > { %912 = shalt.err (!%p909_p1)
}
 0x29d   : > { %719 = dma.vmem_to_hbm [thread:$0]  (%p1365_p7), %s518_s13, 128, %s1259_s11, %s489_s26  }
 0x29e   : > { %s306_s24 = scalar_lea.vmem [#allocation8], %s1231_s12  ;;  %s1285_s14 = scalar_lea.hbm %s1337_s3, %s694_s5 }
 0x29f   : > { %s503_s21 = sshll.u32 %s306_s24, 4  ;;  %s484_s1 = scalar_lea.sflag [#allocation4], %s1228_s25  ;;  %s1287_s21 = int_to_ptr.vmem [resolvable:$true] %s503_s21 }
 0x2a0   : > { %s913_s7 = scalar_lea.vmem %s1287_s21, 128  ;;  %s1011_s18 = smov [#allocation8]  }
 0x2a1   : > { %p914_p8 = scmp.ne.s32.totalorder %s1287_s21, %s913_s7  ;;  %s917_s12 = sshll.u32 %s1011_s18, 4  ;;  %s918_s12 = int_to_ptr.vmem [resolvable:$false] %s917_s12 }
 0x2a2   : > { %s919_s5 = scalar_lea.vmem %s918_s12, 256  ;;  %p920_p12 = scmp.lt.s32.totalorder %s1287_s21, %s918_s12 }
 0x2a3   : > { %p915_p9 = pnand %p914_p8, %p1365_p7  ;;  %p921_p11 = scmp.lt.s32.totalorder %s919_s5, %s913_s7 }
 0x2a5   : > { %p916_p10 = pneg %p915_p9  ;;  %p922_p5 = por %p921_p11, %p920_p12 }
 0x2a7   : > { %p923_p4 = pnand %p922_p5, %p916_p10 }
 0x363   : > { %v477_v16 = vpop.f32.mrb[0].mxu1 }
 0x364   : > { %481 = vst.msk [vmem:[%s306_s24] sm:$0xff] %vm316_vm1, %v477_v16  ;;  %v711_v17 = vpop.f32.mrb[1].mxu1 }
 0x365   : > { %926 = shalt.err (!%p923_p4)
}
 0x366   : > { %s927_s25 = scalar_lea.hbm %s1285_s14, 128  ;;  %s931_s26 = scalar_lea.hbm %s1337_s3, 1024 }
 0x367   : > { %p928_p6 = scmp.ne.s32.totalorder %s1285_s14, %s927_s25  ;;  %p932_p3 = scmp.lt.u32.totalorder %s1285_s14, %s1337_s3 }
 0x368   : > { %p933_p0 = scmp.lt.u32.totalorder %s931_s26, %s927_s25  ;;  %p935_p8 = scmp.lt.u32.totalorder %s927_s25, %s1285_s14 }
 0x369   : > { %p929_p2 = pnand %p928_p6, %p1365_p7 }
 0x36a   : > { %p934_p1 = por %p933_p0, %p932_p3 }
 0x36b   : > { %p930_p13 = pneg %p929_p2 }
 0x36c   : > { %p936_p9 = por %p935_p8, %p934_p1 }
 0x36e   : > { %p937_p10 = pnand %p936_p9, %p930_p13 }
 0x370   : > { %940 = shalt.err (!%p937_p10)
}
 0x371   : > { %718 = dma.vmem_to_hbm [thread:$0]  (%p1365_p7), %s1287_s21, 128, %s1285_s14, %s484_s1  }
 0x372 PF: > { %s1366_s9 = sld [smem:[#allocation18_spill]]  ;;  %p740_p12 = scmp.ge.s32.totalorder %s1003_s20, 2 }
 0x373   : > { %s529_s10 = sand.u32 1, %s983_s15  }
 0x374   : > { %s530_s30 = scalar_lea.sflag [#allocation4], %s529_s10 }
 0x378   : > { %p1367_p11 = scmp.ne.s32.totalorder %s1366_s9, 0 }
 0x37a   : > { %p733_p5 = pnand %p740_p12, %p1367_p11 }
 0x37c   : > { %974 = dma.done.wait (!%p733_p5), %s530_s30, 128  }
 0x37d   : > { %976 = vsyncadd (!%p733_p5), %s530_s30, 4294967168  ;;  %s539_s19 = scalar_lea.sflag [#allocation10], %s529_s10 }
 0x37e   : > { %978 = dma.done.wait (!%p733_p5), %s539_s19, 128  }
 0x37f   : > { %980 = vsyncadd (!%p733_p5), %s539_s19, 4294967168  ;;  %s27_s20 = sadd.s32 1, %s1003_s20   ;;  %s1368_s28 = sld [smem:[#allocation17_spill]] }
 0x380   : > { %p24_p4 = scmp.ge.s32.totalorder %s27_s20, 10   ;;  %s1369_s18 = sld [smem:[#allocation15_spill]] }
 0x381   : > { %s1370_s19 = sld [smem:[#allocation16_spill]]  ;;  %s1371_s15 = smov %s987_s16 }
 0x382   : > { %s1372_s16 = smov %s991_s17  ;;  %26 = sbr.rel (!%p24_p4) target bundleno = 12 (0xc), region = 118 }
 0x385   : > { %s1373_s17 = smov %s1368_s28 }
 0x389   :  { %544 = vsyncpa [#allocation3], 1 }
 0x38a   :  { %546 = vsyncpa [#allocation3 + $0x1], 1 }
 0x38b   :  { %547 = vsyncpa [#allocation6], 1 }
 0x38c   :  { %549 = vsyncpa [#allocation6 + $0x1], 1 }
 0x38d   :  { %550 = vsyncpa [#allocation4], 1 }
 0x38e   :  { %552 = vsyncpa [#allocation4 + $0x1], 1 }
 0x38f   :  { %553 = vsyncpa [#allocation10], 1 }
 0x390   :  { %555 = vsyncpa [#allocation10 + $0x1], 1 }

</bundles_post_ra>
